<compile_context>
chip_gen: v5e
topology: v5e:2x2
jax: 0.10.0
libtpu: 0.0.40
codegen_flags: <defaults>
</compile_context>

<pallas_src>
import functools

import jax
import jax.numpy as jnp
from jax.experimental import pallas as pl
from jax.experimental.pallas import tpu as pltpu

# Module hyperparameters (from BoundedSoftplus.__init__ defaults).
BETA = 1.0
INV_BETA = 1.0 / BETA
THRESHOLD = 6.0                 # clamp max
EPS = 1e-6
SOFTPLUS_LINEAR_THRESH = 20.0   # overflow guard for exp(beta*x)


def _tpu_generation():
    """Best-effort TPU generation from device_kind; None if unknown."""
    try:
        kind = jax.devices()[0].device_kind.lower()
    except Exception:
        return None
    for gen in (7, 6, 5, 4):
        if (f"v{gen}" in kind) or (f"tpu{gen}" in kind) or (f"tpu {gen}" in kind):
            return gen
    return None


def _softplus_clamped(x, compute_dtype):
    """clamp(softplus(x, BETA), max=THRESHOLD) + EPS, computed in compute_dtype."""
    x = x.astype(compute_dtype)
    bx = x * jnp.asarray(BETA, compute_dtype)
    # min(bx, 20) only guards exp() overflow; since THRESHOLD (6) < 20 the
    # final clamped value equals PyTorch's branchy softplus exactly.
    bx = jnp.minimum(bx, jnp.asarray(SOFTPLUS_LINEAR_THRESH, compute_dtype))
    sp = jnp.log1p(jnp.exp(bx)) * jnp.asarray(INV_BETA, compute_dtype)
    return (jnp.minimum(sp, jnp.asarray(THRESHOLD, compute_dtype))
            + jnp.asarray(EPS, compute_dtype))


def _bounded_softplus_kernel(x_ref, o_ref, *, compute_dtype):
    o_ref[...] = _softplus_clamped(x_ref[...], compute_dtype).astype(o_ref.dtype)


def bounded_softplus(x):
    """Apply BoundedSoftplus to an NCHW tensor via a tiled Pallas TPU kernel."""
    orig_shape = x.shape
    orig_dtype = x.dtype
    n_elem = x.size
    if n_elem == 0:
        return x

    itemsize = jnp.dtype(orig_dtype).itemsize
    gen = _tpu_generation()

    # Compute dtype: bf16 math on v6e/v7x for bf16 I/O (bf16 VPU/EUP exists;
    # result is clamped at 6 and cast back to bf16, so numerics match).
    # f32 everywhere else (v5e has no bf16 VPU/EUP).
    if orig_dtype == jnp.bfloat16 and gen is not None and gen >= 6:
        compute_dtype = jnp.bfloat16
    else:
        compute_dtype = jnp.float32

    # Generation-aware per-block byte target. Double-buffered in + out ->
    # 4x block_bytes live in VMEM.
    if gen is not None and gen >= 6:
        block_bytes = 4 << 20        # 16 MiB live < 32 MiB scoped default
    else:
        block_bytes = 2 << 20        # 8 MiB live < 16 MiB scoped default (v5e)

    x_flat = x.reshape(-1)

    # Pick the widest lane-dense last dim that divides numel (free reshape,
    # unmasked full-width stores, fewer/larger DMA descriptors).
    lane = None
    for cand in (1024, 512, 256, 128):
        if n_elem % cand == 0:
            lane = cand
            break

    tail = None
    if lane is None:
        # Ragged: run the kernel on the lane-aligned prefix and handle the
        # (<128-element) remainder with plain jnp — avoids a full jnp.pad +
        # slice round trip through HBM.
        lane = 128
        aligned = (n_elem // lane) * lane
        if aligned == 0:
            y = _softplus_clamped(x_flat, compute_dtype).astype(orig_dtype)
            return y.reshape(orig_shape)
        tail = x_flat[aligned:]
        x_flat = x_flat[:aligned]

    rows = x_flat.size // lane
    x2d = x_flat.reshape(rows, lane)

    # Tile rows: dtype-aware sublane packing multiple, generation-aware block
    # byte target, and a minimum grid length of 4 (2 TCs x 2 pipeline stages)
    # whenever rows allow.
    sublane_mult = 8 * max(1, 4 // itemsize)   # 8 f32, 16 bf16, 32 int8/fp8
    target_rows = max(sublane_mult, block_bytes // (lane * itemsize))
    min_grid = 4
    if rows <= sublane_mult:
        tile_r = rows                           # full dim -> always legal
    else:
        tile_r = min(target_rows, rows)
        if rows >= min_grid * sublane_mult:
            tile_r = min(tile_r, -(-rows // min_grid))   # keep grid >= 4
        tile_r = max(sublane_mult, (tile_r // sublane_mult) * sublane_mult)
    grid = (pl.cdiv(rows, tile_r),)

    cost = pl.CostEstimate(
        flops=5 * n_elem,
        transcendentals=2 * n_elem,             # exp + log1p per element
        bytes_accessed=2 * n_elem * itemsize,
    )

    out2d = pl.pallas_call(
        functools.partial(_bounded_softplus_kernel, compute_dtype=compute_dtype),
        out_shape=jax.ShapeDtypeStruct((rows, lane), orig_dtype),
        grid=grid,
        in_specs=[pl.BlockSpec((tile_r, lane), lambda i: (i, 0))],
        out_specs=pl.BlockSpec((tile_r, lane), lambda i: (i, 0)),
        compiler_params=pltpu.CompilerParams(
            dimension_semantics=("parallel",)),
        cost_estimate=cost,
    )(x2d)

    out_flat = out2d.reshape(-1)
    if tail is not None:
        out_tail = _softplus_clamped(tail, compute_dtype).astype(orig_dtype)
        out_flat = jnp.concatenate([out_flat, out_tail])
    return out_flat.reshape(orig_shape)


if __name__ == "__main__":
    key = jax.random.PRNGKey(0)
    # Small NCHW input consistent with the module's usage (elementwise act).
    x = jax.random.normal(key, (2, 4, 16, 16), dtype=jnp.float32) * 5.0

    y = bounded_softplus(x)
    jax.block_until_ready(y)

    # Pure-JAX reference matching torch.nn.functional.softplus semantics.
    def ref(v):
        bx = BETA * v
        sp = jnp.where(bx > SOFTPLUS_LINEAR_THRESH, v, jnp.log1p(jnp.exp(bx)) / BETA)
        return jnp.minimum(sp, THRESHOLD) + EPS

    assert y.shape == x.shape and y.dtype == x.dtype
    assert jnp.allclose(y, ref(x), atol=1e-6, rtol=1e-6), "f32 mismatch vs reference"

    # Ragged-shape path (numel not divisible by 128): aligned-prefix kernel +
    # plain-jnp tail, no pad/slice round trip.
    xr = jax.random.normal(jax.random.PRNGKey(0), (2, 3, 7, 11), dtype=jnp.float32) * 5.0
    yr = bounded_softplus(xr)
    jax.block_until_ready(yr)
    assert yr.shape == xr.shape and yr.dtype == xr.dtype
    assert jnp.allclose(yr, ref(xr), atol=1e-6, rtol=1e-6), "ragged mismatch vs reference"

    # bf16 I/O exercises the bf16 compute path on v6e/v7x (f32 elsewhere).
    xb = x.astype(jnp.bfloat16)
    yb = bounded_softplus(xb)
    jax.block_until_ready(yb)
    yb_ref = ref(xb.astype(jnp.float32)).astype(jnp.bfloat16)
    assert yb.shape == xb.shape and yb.dtype == jnp.bfloat16
    assert jnp.allclose(yb.astype(jnp.float32), yb_ref.astype(jnp.float32),
                        atol=6e-2, rtol=3e-2), "bf16 mismatch vs reference"

    print("KERNEL_OK")
</pallas_src>

<mosaic_0001>
module attributes {stable_mosaic.version = 11 : i64} {
  func.func @_bounded_softplus_kernel(%arg0: i32, %arg1: memref<2x1024xf32, #tpu.memory_space<vmem>>, %arg2: memref<2x1024xf32, #tpu.memory_space<vmem>>) attributes {dimension_semantics = [#tpu.dimension_semantics<parallel>], iteration_bounds = array<i64: 1>, scalar_prefetch = 0 : i64, scratch_operands = 0 : i64, tpu.core_type = #tpu.core_type<tc>, window_params = [{transform_indices = @transform_0, window_bounds = array<i64: 2, 1024>}, {transform_indices = @transform_1, window_bounds = array<i64: 2, 1024>}]} {
    %c0 = arith.constant 0 : index
    %c0_0 = arith.constant 0 : index
    %0 = vector.load %arg1[%c0, %c0_0] : memref<2x1024xf32, #tpu.memory_space<vmem>>, vector<2x1024xf32>
    %cst = arith.constant 1.000000e+00 : f32
    %1 = vector.broadcast %cst : f32 to vector<2x1024xf32>
    %2 = arith.mulf %0, %1 : vector<2x1024xf32>
    %cst_1 = arith.constant 2.000000e+01 : f32
    %3 = vector.broadcast %cst_1 : f32 to vector<2x1024xf32>
    %4 = arith.minimumf %2, %3 : vector<2x1024xf32>
    %5 = math.exp %4 : vector<2x1024xf32>
    %6 = math.log1p %5 : vector<2x1024xf32>
    %cst_2 = arith.constant 1.000000e+00 : f32
    %7 = vector.broadcast %cst_2 : f32 to vector<2x1024xf32>
    %8 = arith.mulf %6, %7 : vector<2x1024xf32>
    %cst_3 = arith.constant 6.000000e+00 : f32
    %9 = vector.broadcast %cst_3 : f32 to vector<2x1024xf32>
    %10 = arith.minimumf %8, %9 : vector<2x1024xf32>
    %cst_4 = arith.constant 9.99999997E-7 : f32
    %11 = vector.broadcast %cst_4 : f32 to vector<2x1024xf32>
    %12 = arith.addf %10, %11 : vector<2x1024xf32>
    %c0_5 = arith.constant 0 : index
    %c0_6 = arith.constant 0 : index
    %13 = vector.load %arg2[%c0_5, %c0_6] : memref<2x1024xf32, #tpu.memory_space<vmem>>, vector<2x1024xf32>
    tpu.vector_store %arg2[%c0_5, %c0_6], %12 {strides = array<i32>} : memref<2x1024xf32, #tpu.memory_space<vmem>>, vector<2x1024xf32>,
    return
  }
  func.func @transform_0(%arg0: i32) -> (i32, i32) {
    %c0_i32 = arith.constant 0 : i32
    %c0_i32_0 = arith.constant 0 : i32
    return %arg0, %c0_i32 : i32, i32
  }
  func.func @transform_1(%arg0: i32) -> (i32, i32) {
    %c0_i32 = arith.constant 0 : i32
    %c0_i32_0 = arith.constant 0 : i32
    return %arg0, %c0_i32 : i32, i32
  }
}

</mosaic_0001>

<bundles_post_ra>
// kernel: tpu_custom_call.1
= control target key start
LH: loop header
LB: loop body
LE: loop exit
PB: predicated region body
PF: predicated region fallthrough
CT: control target
= control target key end

     0   :  { %6 = vsyncpa [#allocation3], 0  ;;  %s152_s0 = inlined_call_operand.hbm [shape: f32[2,1024], index: 0, kind: input, shape index: {}]   ;;  %s153_s1 = inlined_call_operand.hbm [shape: f32[2,1024], index: 1, kind: output, shape index: {}]  }
   0x1   :  { %7 = vsyncpa [#allocation4], 0  ;;  %s13_s8 = sshll.u32 %s152_s0, 4  ;;  %s134_s9 = smov [#allocation2]   ;;  %s14_s8 = int_to_ptr.hbm [resolvable:$true] %s13_s8 }
   0x2   :  { %s15_s10 = sshll.u32 %s134_s9, 4  ;;  %s16_s10 = int_to_ptr.vmem [resolvable:$true] %s15_s10 }
   0x3   :  { %18 = dma.hbm_to_vmem [thread:$0]  %s14_s8, 256, %s16_s10, [#allocation3]  }
   0x4   :  { %130 = dma.done.wait [#allocation3], 256  }
   0x5   :  { %131 = vsyncadd [#allocation3], 4294967040  ;;  %v23_v0 = vld [vmem:[#allocation2] sm:$0xff]  ;;  %v24_v1 = vld [vmem:[#allocation2 + $0x8] sm:$0xff]  ;;  %s135_s0 = smov [#allocation5]   ;;  %s62_s14 = sshll.u32 %s153_s1, 4  ;;  %s63_s14 = int_to_ptr.hbm [resolvable:$true] %s62_s14 }
   0x6   :  { %v25_v2 = vmin.f32 %v23_v0, 20.0  ;;  %v26_v3 = vmin.f32 %v24_v1, 20.0  ;;  %s60_s11 = sshll.u32 %s135_s0, 4  ;;  %s61_s11 = int_to_ptr.vmem [resolvable:$true] %s60_s11 }
   0x8   :  { %v27_v4 = vmul.f32 1.442695, %v25_v2  ;;  %v29_v5 = vmul.f32 1.442695, %v26_v3 }
   0xa   :  { %74 = vpow2.f32 %v27_v4 }
   0xb   :  { %76 = vpow2.f32 %v29_v5 }
  0x10   :  { %v75_v6 = vpop.eup %74 }
  0x11   :  { %v77_v7 = vpop.eup %76  ;;  %v31_v8 = vadd.f32 1.0, %v75_v6  ;;  %v34_v9 = vmul.f32 -0.5, %v75_v6  ;;  %v37_v13 = vand.u32 2147483647, %v75_v6 }
  0x12   :  { %v40_v10 = vadd.f32 1.0, %v77_v7  ;;  %v43_v11 = vmul.f32 -0.5, %v77_v7  ;;  %v46_v15 = vand.u32 2147483647, %v77_v7 }
  0x13   :  { %78 = vlog2.f32 %v31_v8  ;;  %v35_v12 = vadd.f32 1.0, %v34_v9  ;;  %vm38_vm0 = vcmp.lt.f32.partialorder %v37_v13, 0.0004427343 }
  0x14   :  { %80 = vlog2.f32 %v40_v10  ;;  %v44_v14 = vadd.f32 1.0, %v43_v11  ;;  %vm47_vm1 = vcmp.lt.f32.partialorder %v46_v15, 0.0004427343 }
  0x15   :  { %v36_v16 = vmul.f32 %v75_v6, %v35_v12 }
  0x16   :  { %v45_v18 = vmul.f32 %v77_v7, %v44_v14 }
  0x19   :  { %v79_v17 = vpop.eup %78 }
  0x1a   :  { %v81_v19 = vpop.eup %80  ;;  %v33_v20 = vmul.f32 0.6931472, %v79_v17 }
  0x1b   :  { %v42_v21 = vmul.f32 0.6931472, %v81_v19 }
  0x1c   :  { %v39_v22 = vsel %vm38_vm0, %v36_v16, %v33_v20 }
  0x1d   :  { %v49_v23 = vmin.f32 %v39_v22, 6.0  ;;  %v48_v24 = vsel %vm47_vm1, %v45_v18, %v42_v21 }
  0x1e   :  { %v50_v25 = vmin.f32 %v48_v24, 6.0 }
  0x1f   :  { %v51_v26 = vadd.f32 1e-06, %v49_v23 }
  0x20   :  { %v52_v27 = vadd.f32 1e-06, %v50_v25 }
  0x21   :  { %53 = vst [vmem:[#allocation5] sm:$0xff] %v51_v26 }
  0x22   :  { %54 = vst [vmem:[#allocation5 + $0x8] sm:$0xff] %v52_v27 }
  0x23   :  { %65 = dma.vmem_to_hbm [thread:$0]  %s61_s11, 256, %s63_s14, [#allocation4]  }
  0x24   :  { %132 = dma.done.wait [#allocation4], 256  }
  0x25   :  { %133 = vsyncadd [#allocation4], 4294967040 }
  0x26   :  { %70 = vsyncpa [#allocation3], 1 }
  0x27   :  { %71 = vsyncpa [#allocation4], 1 }

</bundles_post_ra>
